<compile_context>
chip_gen: v6e
topology: v6e:2x2x1
jax: 0.10.0
libtpu: 0.0.40
codegen_flags: <defaults>
</compile_context>

<pallas_src>
import functools

import jax
import jax.numpy as jnp
from jax.experimental import pallas as pl
from jax.experimental.pallas import tpu as pltpu

EPS = 1e-5
LANE = 128
SUBLANE = 8


def _round_up(v, m):
    return (v + m - 1) // m * m


def _pick_tile(dim, candidates):
    for c in candidates:
        if c <= dim and dim % c == 0:
            return c
    return dim


def _pad2d(a, rows, cols):
    return jnp.pad(a, ((0, rows - a.shape[0]), (0, cols - a.shape[1])))


def _linear_bn_relu_kernel(x_ref, w_ref, g_ref, be_ref, o_ref, acc_ref,
                           *, inv_n, n_real, mask_rows):
    """out = relu(BN(x @ W)) for one output-feature tile, reducing over K."""
    k = pl.program_id(1)

    @pl.when(k == 0)
    def _():
        acc_ref[...] = jnp.zeros_like(acc_ref)

    acc_ref[...] += jnp.dot(x_ref[...], w_ref[...],
                            preferred_element_type=jnp.float32)

    @pl.when(k == pl.num_programs(1) - 1)
    def _():
        h = acc_ref[...]
        # Single-pass batch stats (padded rows contribute exact zeros to the sums).
        mu = jnp.sum(h, axis=0, keepdims=True) * inv_n
        var = jnp.sum(h * h, axis=0, keepdims=True) * inv_n - mu * mu
        # Folded BN affine: one mul + one add per element; rsqrt goes to the EUP.
        scale = g_ref[...] * jax.lax.rsqrt(var + EPS)
        shift = be_ref[...] - mu * scale
        out = jnp.maximum(h * scale + shift, 0.0)
        if mask_rows:
            # Keep padded rows exactly zero so the next layer's BN sums stay exact.
            rows = jax.lax.broadcasted_iota(jnp.int32, out.shape, 0)
            out = jnp.where(rows < n_real, out, 0.0)
        o_ref[...] = out.astype(o_ref.dtype)


def _linear_bn_res_relu_kernel(h_ref, w_ref, g_ref, be_ref, xres_ref, o_ref,
                               acc_ref, *, inv_n):
    """out = relu(BN(h @ W) + x) for one output-feature tile, reducing over K."""
    k = pl.program_id(1)

    @pl.when(k == 0)
    def _():
        acc_ref[...] = jnp.zeros_like(acc_ref)

    acc_ref[...] += jnp.dot(h_ref[...], w_ref[...],
                            preferred_element_type=jnp.float32)

    @pl.when(k == pl.num_programs(1) - 1)
    def _():
        h2 = acc_ref[...]
        mu = jnp.sum(h2, axis=0, keepdims=True) * inv_n
        var = jnp.sum(h2 * h2, axis=0, keepdims=True) * inv_n - mu * mu
        scale = g_ref[...] * jax.lax.rsqrt(var + EPS)
        shift = be_ref[...] - mu * scale
        res = xres_ref[...].astype(jnp.float32)
        o_ref[...] = jnp.maximum(h2 * scale + shift + res, 0.0).astype(o_ref.dtype)


def residual_block_bn(x, w1, b1, g1, be1, w2, b2, g2, be2,
                      *, mxu_dtype=jnp.bfloat16):
    """x: (N, F). w1/w2 are torch-layout (F_out, F_in); other params are (F,)."""
    N, F = x.shape
    Np = _round_up(max(N, SUBLANE), SUBLANE)     # sublane-aligned batch
    Fp = _round_up(max(F, LANE), LANE)           # lane-dense feature axis
    tn = _pick_tile(Fp, (512, 256, 128))         # output-feature tile
    tk = _pick_tile(Fp, (1024, 512, 256, 128))   # contraction tile

    # ---- wrapper-side layout plumbing (zero padding is exact: see kernel notes) ----
    x_f32 = _pad2d(x.astype(jnp.float32), Np, Fp)          # residual input (exact)
    x_mm = x_f32.astype(mxu_dtype)                          # matmul input
    w1t = _pad2d(w1.T.astype(jnp.float32), Fp, Fp).astype(mxu_dtype)
    w2t = _pad2d(w2.T.astype(jnp.float32), Fp, Fp).astype(mxu_dtype)
    row = lambda v: jnp.pad(v.astype(jnp.float32), (0, Fp - F)).reshape(1, Fp)
    # Linear biases are exactly cancelled by training-mode BN (mean shift), so the
    # kernels never load them.
    del b1, b2

    grid = (Fp // tn, Fp // tk)                 # (output-feature tiles, K tiles)
    act_spec = pl.BlockSpec((Np, tk), lambda j, k: (0, k))   # activations over K
    w_spec = pl.BlockSpec((tk, tn), lambda j, k: (k, j))     # streamed weight tiles
    vec_spec = pl.BlockSpec((1, tn), lambda j, k: (0, j))    # per-feature BN params
    out_spec = pl.BlockSpec((Np, tn), lambda j, k: (0, j))   # resident across K

    cparams = pltpu.CompilerParams(
        dimension_semantics=("parallel", "arbitrary"),
        vmem_limit_bytes=48 * 1024 * 1024,      # headroom under v7x's 64 MiB VMEM
    )
    common = dict(
        grid=grid,
        scratch_shapes=[pltpu.VMEM((Np, tn), jnp.float32)],
        compiler_params=cparams,
    )

    k1 = functools.partial(_linear_bn_relu_kernel,
                           inv_n=1.0 / N, n_real=N, mask_rows=(Np != N))
    h = pl.pallas_call(
        k1,
        out_shape=jax.ShapeDtypeStruct((Np, Fp), mxu_dtype),
        in_specs=[act_spec, w_spec, vec_spec, vec_spec],
        out_specs=out_spec,
        **common,
    )(x_mm, w1t, row(g1), row(be1))

    k2 = functools.partial(_linear_bn_res_relu_kernel, inv_n=1.0 / N)
    out_p = pl.pallas_call(
        k2,
        out_shape=jax.ShapeDtypeStruct((Np, Fp), x.dtype),
        in_specs=[act_spec, w_spec, vec_spec, vec_spec, out_spec],
        out_specs=out_spec,
        **common,
    )(h, w2t, row(g2), row(be2), x_f32)

    return out_p[:N, :F]


def residual_block_bn_ref(x, w1, b1, g1, be1, w2, b2, g2, be2):
    """Pure-JAX reference mirroring the PyTorch forward (training-mode BN)."""
    def bn(h, g, be):
        mu = jnp.mean(h, axis=0, keepdims=True)
        var = jnp.mean((h - mu) ** 2, axis=0, keepdims=True)
        return (h - mu) / jnp.sqrt(var + EPS) * g + be

    h = jnp.maximum(bn(x @ w1.T + b1, g1, be1), 0.0)
    h2 = bn(h @ w2.T + b2, g2, be2)
    return jnp.maximum(h2 + x, 0.0)


if __name__ == "__main__":
    N, F = 8, 32  # batch, features

    key = jax.random.PRNGKey(0)
    kx, kw1, kb1, kw2, kb2 = jax.random.split(key, 5)

    x = jax.random.normal(kx, (N, F), dtype=jnp.float32)

    # nn.Linear default init: U(-1/sqrt(F), 1/sqrt(F)); BatchNorm1d: weight=1, bias=0
    bound = 1.0 / jnp.sqrt(jnp.float32(F))
    w1 = jax.random.uniform(kw1, (F, F), jnp.float32, -bound, bound)
    b1 = jax.random.uniform(kb1, (F,), jnp.float32, -bound, bound)
    w2 = jax.random.uniform(kw2, (F, F), jnp.float32, -bound, bound)
    b2 = jax.random.uniform(kb2, (F,), jnp.float32, -bound, bound)
    g1 = jnp.ones((F,), jnp.float32)
    be1 = jnp.zeros((F,), jnp.float32)
    g2 = jnp.ones((F,), jnp.float32)
    be2 = jnp.zeros((F,), jnp.float32)

    ref = residual_block_bn_ref(x, w1, b1, g1, be1, w2, b2, g2, be2)

    # Exact path (f32 MXU inputs): tight check against the f32 reference.
    out_f32 = jax.block_until_ready(
        residual_block_bn(x, w1, b1, g1, be1, w2, b2, g2, be2,
                          mxu_dtype=jnp.float32))
    assert out_f32.shape == (N, F)
    assert jnp.allclose(out_f32, ref, atol=1e-4, rtol=1e-4), \
        "f32 kernel mismatch vs pure-JAX reference"

    # Default fast path: bf16 MXU inputs, f32 accumulation and BN math.
    out_bf16 = jax.block_until_ready(
        residual_block_bn(x, w1, b1, g1, be1, w2, b2, g2, be2))
    assert out_bf16.shape == (N, F)
    assert jnp.allclose(out_bf16, ref, atol=5e-2, rtol=5e-2), \
        "bf16 kernel mismatch vs pure-JAX reference"

    print("KERNEL_OK")
</pallas_src>

<mosaic_0001>
module attributes {stable_mosaic.version = 11 : i64} {
  func.func @_linear_bn_relu_kernel(%arg0: i32, %arg1: i32, %arg2: memref<8x128xf32, #tpu.memory_space<vmem>>, %arg3: memref<128x128xf32, #tpu.memory_space<vmem>>, %arg4: memref<1x128xf32, #tpu.memory_space<vmem>>, %arg5: memref<1x128xf32, #tpu.memory_space<vmem>>, %arg6: memref<8x128xf32, #tpu.memory_space<vmem>>, %arg7: memref<8x128xf32, #tpu.memory_space<vmem>>) attributes {dimension_semantics = [#tpu.dimension_semantics<parallel>, #tpu.dimension_semantics<arbitrary>], iteration_bounds = array<i64: 1, 1>, scalar_prefetch = 0 : i64, scratch_operands = 1 : i64, tpu.core_type = #tpu.core_type<tc>, window_params = [{transform_indices = @transform_0, window_bounds = array<i64: 8, 128>}, {transform_indices = @transform_1, window_bounds = array<i64: 128, 128>}, {transform_indices = @transform_2, window_bounds = array<i64: 1, 128>}, {transform_indices = @transform_3, window_bounds = array<i64: 1, 128>}, {transform_indices = @transform_4, window_bounds = array<i64: 8, 128>}]} {
    %c0_i32 = arith.constant 0 : i32
    %0 = arith.cmpi eq, %arg1, %c0_i32 : i32
    %1 = arith.extui %0 : i1 to i32
    %c0_i32_0 = arith.constant 0 : i32
    %2 = arith.cmpi ne, %1, %c0_i32_0 : i32
    scf.if %2 {
      %cst_10 = arith.constant 0.000000e+00 : f32
      %12 = vector.broadcast %cst_10 : f32 to vector<8x128xf32>
      %c0_11 = arith.constant 0 : index
      %c0_12 = arith.constant 0 : index
      %13 = vector.load %arg7[%c0_11, %c0_12] : memref<8x128xf32, #tpu.memory_space<vmem>>, vector<8x128xf32>
      tpu.vector_store %arg7[%c0_11, %c0_12], %12 {strides = array<i32>} : memref<8x128xf32, #tpu.memory_space<vmem>>, vector<8x128xf32>,
    } else {
    }
    %c0 = arith.constant 0 : index
    %c0_1 = arith.constant 0 : index
    %3 = vector.load %arg7[%c0, %c0_1] : memref<8x128xf32, #tpu.memory_space<vmem>>, vector<8x128xf32>
    %c0_2 = arith.constant 0 : index
    %c0_3 = arith.constant 0 : index
    %4 = vector.load %arg2[%c0_2, %c0_3] : memref<8x128xf32, #tpu.memory_space<vmem>>, vector<8x128xf32>
    %c0_4 = arith.constant 0 : index
    %c0_5 = arith.constant 0 : index
    %5 = vector.load %arg3[%c0_4, %c0_5] : memref<128x128xf32, #tpu.memory_space<vmem>>, vector<128x128xf32>
    %cst = arith.constant dense<0.000000e+00> : vector<8x128xf32>
    %6 = tpu.matmul %4, %5, %cst {dimension_numbers = #tpu.dot_dimension_numbers<[1], [0], [0], [1], [0, 0, 1, 1], [], []>} : vector<8x128xf32>, vector<128x128xf32>, vector<8x128xf32> -> vector<8x128xf32>
    %7 = arith.addf %3, %6 : vector<8x128xf32>
    %c0_6 = arith.constant 0 : index
    %c0_7 = arith.constant 0 : index
    %8 = vector.load %arg7[%c0_6, %c0_7] : memref<8x128xf32, #tpu.memory_space<vmem>>, vector<8x128xf32>
    tpu.vector_store %arg7[%c0_6, %c0_7], %7 {strides = array<i32>} : memref<8x128xf32, #tpu.memory_space<vmem>>, vector<8x128xf32>,
    %c0_i32_8 = arith.constant 0 : i32
    %9 = arith.cmpi eq, %arg1, %c0_i32_8 : i32
    %10 = arith.extui %9 : i1 to i32
    %c0_i32_9 = arith.constant 0 : i32
    %11 = arith.cmpi ne, %10, %c0_i32_9 : i32
    scf.if %11 {
      %c0_10 = arith.constant 0 : index
      %c0_11 = arith.constant 0 : index
      %12 = vector.load %arg7[%c0_10, %c0_11] : memref<8x128xf32, #tpu.memory_space<vmem>>, vector<8x128xf32>
      %cst_12 = arith.constant dense<0.000000e+00> : vector<128xf32>
      %13 = vector.multi_reduction <add>, %12, %cst_12 [0] : vector<8x128xf32> to vector<128xf32>
      %14 = vector.shape_cast %13 : vector<128xf32> to vector<1x128xf32>
      %cst_13 = arith.constant 1.250000e-01 : f32
      %15 = vector.broadcast %cst_13 : f32 to vector<1x128xf32>
      %16 = arith.mulf %14, %15 : vector<1x128xf32>
      %17 = arith.mulf %12, %12 : vector<8x128xf32>
      %cst_14 = arith.constant dense<0.000000e+00> : vector<128xf32>
      %18 = vector.multi_reduction <add>, %17, %cst_14 [0] : vector<8x128xf32> to vector<128xf32>
      %19 = vector.shape_cast %18 : vector<128xf32> to vector<1x128xf32>
      %cst_15 = arith.constant 1.250000e-01 : f32
      %20 = vector.broadcast %cst_15 : f32 to vector<1x128xf32>
      %21 = arith.mulf %19, %20 : vector<1x128xf32>
      %22 = arith.mulf %16, %16 : vector<1x128xf32>
      %23 = arith.subf %21, %22 : vector<1x128xf32>
      %c0_16 = arith.constant 0 : index
      %c0_17 = arith.constant 0 : index
      %24 = vector.load %arg4[%c0_16, %c0_17] : memref<1x128xf32, #tpu.memory_space<vmem>>, vector<1x128xf32>
      %cst_18 = arith.constant 9.99999974E-6 : f32
      %25 = vector.broadcast %cst_18 : f32 to vector<1x128xf32>
      %26 = arith.addf %23, %25 : vector<1x128xf32>
      %27 = math.rsqrt %26 : vector<1x128xf32>
      %28 = arith.mulf %24, %27 : vector<1x128xf32>
      %c0_19 = arith.constant 0 : index
      %c0_20 = arith.constant 0 : index
      %29 = vector.load %arg5[%c0_19, %c0_20] : memref<1x128xf32, #tpu.memory_space<vmem>>, vector<1x128xf32>
      %30 = arith.mulf %16, %28 : vector<1x128xf32>
      %31 = arith.subf %29, %30 : vector<1x128xf32>
      %32 = vector.broadcast %28 : vector<1x128xf32> to vector<8x128xf32>
      %33 = arith.mulf %12, %32 : vector<8x128xf32>
      %34 = vector.broadcast %31 : vector<1x128xf32> to vector<8x128xf32>
      %35 = arith.addf %33, %34 : vector<8x128xf32>
      %cst_21 = arith.constant 0.000000e+00 : f32
      %36 = vector.broadcast %cst_21 : f32 to vector<8x128xf32>
      %37 = arith.maximumf %35, %36 : vector<8x128xf32>
      %c0_22 = arith.constant 0 : index
      %c0_23 = arith.constant 0 : index
      %38 = vector.load %arg6[%c0_22, %c0_23] : memref<8x128xf32, #tpu.memory_space<vmem>>, vector<8x128xf32>
      tpu.vector_store %arg6[%c0_22, %c0_23], %37 {strides = array<i32>} : memref<8x128xf32, #tpu.memory_space<vmem>>, vector<8x128xf32>,
    } else {
    }
    return
  }
  func.func @transform_0(%arg0: i32, %arg1: i32) -> (i32, i32) {
    %c0_i32 = arith.constant 0 : i32
    %c0_i32_0 = arith.constant 0 : i32
    return %c0_i32, %arg1 : i32, i32
  }
  func.func @transform_1(%arg0: i32, %arg1: i32) -> (i32, i32) {
    %c0_i32 = arith.constant 0 : i32
    return %arg1, %arg0 : i32, i32
  }
  func.func @transform_2(%arg0: i32, %arg1: i32) -> (i32, i32) {
    %c0_i32 = arith.constant 0 : i32
    %c0_i32_0 = arith.constant 0 : i32
    return %c0_i32, %arg0 : i32, i32
  }
  func.func @transform_3(%arg0: i32, %arg1: i32) -> (i32, i32) {
    %c0_i32 = arith.constant 0 : i32
    %c0_i32_0 = arith.constant 0 : i32
    return %c0_i32, %arg0 : i32, i32
  }
  func.func @transform_4(%arg0: i32, %arg1: i32) -> (i32, i32) {
    %c0_i32 = arith.constant 0 : i32
    %c0_i32_0 = arith.constant 0 : i32
    return %c0_i32, %arg0 : i32, i32
  }
}

</mosaic_0001>

<bundles_post_ra>
// kernel: tpu_custom_call.1
= control target key start
LH: loop header
LB: loop body
LE: loop exit
PB: predicated region body
PF: predicated region fallthrough
CT: control target
= control target key end

     0   :  { %9 = vsyncpa [#allocation4], 0  ;;  %s373_s0 = inlined_call_operand.hbm [shape: f32[8,128], index: 0, kind: input, shape index: {}]   ;;  %s374_s1 = inlined_call_operand.hbm [shape: f32[128,128], index: 1, kind: input, shape index: {}]   ;;  %s375_s2 = inlined_call_operand.vmem [shape: f32[1,128], index: 2, kind: input, shape index: {}]   ;;  %s376_s3 = inlined_call_operand.vmem [shape: f32[1,128], index: 3, kind: input, shape index: {}]   ;;  %s377_s4 = inlined_call_operand.hbm [shape: f32[8,128], index: 4, kind: output, shape index: {}]  }
   0x1   :  { %10 = vsyncpa [#allocation7], 0 }
   0x2   :  { %11 = vsyncpa [#allocation5], 0  ;;  %s326_s15 = smov [#allocation3]   ;;  %s327_s17 = smov [#allocation6]  }
   0x3   :  { %s18_s16 = sshll.u32 %s326_s15, 4  ;;  %s27_s18 = sshll.u32 %s327_s17, 4  ;;  %s19_s16 = int_to_ptr.vmem [resolvable:$true] %s18_s16  ;;  %s28_s18 = int_to_ptr.vmem [resolvable:$true] %s27_s18 }
   0x4   :  { %s268_s19 = scalar_lea.vmem %s19_s16, 128  ;;  %p273_p1 = scmp.lt.s32.totalorder %s19_s16, %s19_s16 }
   0x5   :  { %p269_p0 = scmp.ne.s32.totalorder %s19_s16, %s268_s19  ;;  %p274_p2 = scmp.lt.s32.totalorder %s268_s19, %s268_s19 }
   0x7   :  { %p275_p3 = por %p274_p2, %p273_p1 }
   0x9   :  { %p276_p4 = pnand %p275_p3, %p269_p0 }
   0xb   :  { %279 = shalt.err (!%p276_p4)
}
   0xc   :  { %21 = dma.hbm_to_vmem [thread:$0]  %s373_s0, 128, %s19_s16, [#allocation4]  }
   0xd   :  { %s288_s22 = scalar_lea.vmem %s28_s18, 2048  ;;  %p293_p6 = scmp.lt.s32.totalorder %s28_s18, %s28_s18 }
   0xe   :  { %p289_p5 = scmp.ne.s32.totalorder %s28_s18, %s288_s22  ;;  %p294_p7 = scmp.lt.s32.totalorder %s288_s22, %s288_s22 }
  0x10   :  { %p295_p8 = por %p294_p7, %p293_p6 }
  0x12   :  { %p296_p9 = pnand %p295_p8, %p289_p5 }
  0x14   :  { %299 = shalt.err (!%p296_p9)
}
  0x15   :  { %s328_s23 = smov 128   ;;  %s329_s24 = smov 8  }
  0x16   :  { %33 = dma.hbm_to_vmem [thread:$0]  %s374_s1, 2048, %s28_s18, [#allocation7], %s328_s23, %s328_s23, %s329_s24  }
  0x17   :  { %320 = dma.done.wait [#allocation4], 128  }
  0x18   :  { %321 = vsyncadd [#allocation4], 4294967168 }
  0x19   :  { %322 = dma.done.wait [#allocation7], 2048  }
  0x1a   :  { %323 = vsyncadd [#allocation7], 4294965248  ;;  %v330_v0 = vmov 0.0   ;;  %vm331_vm0 = vmmov 0   ;;  %v66_v1 = vld [vmem:[#allocation6 + $0x78] sm:$0xff]  ;;  %v65_v2 = vld [vmem:[#allocation6 + $0x70] sm:$0xff]  ;;  %v168_v38 = vlaneseq }
  0x1b   :  { %216 = vmatprep.subr.mxu0 %v330_v0  ;;  %248 = vmatprep.mubr.msk.f32.mxu0 %vm331_vm0, %v330_v0  ;;  %v64_v3 = vld [vmem:[#allocation6 + $0x68] sm:$0xff]  ;;  %v63_v4 = vld [vmem:[#allocation6 + $0x60] sm:$0xff]  ;;  %v62_v5 = vld [vmem:[#allocation6 + $0x58] sm:$0xff]  ;;  %s332_s29 = smov [#allocation8]  }
  0x1c   :  { %217 = vmatpush3.msra.mxu0 %v66_v1  ;;  %v61_v6 = vld [vmem:[#allocation6 + $0x50] sm:$0xff]  ;;  %v60_v7 = vld [vmem:[#allocation6 + $0x48] sm:$0xff]  ;;  %v59_v8 = vld [vmem:[#allocation6 + $0x40] sm:$0xff]  ;;  %v169_v39 = vshrl.u32 %v168_v38, 7  ;;  %s189_s30 = sshll.u32 %s332_s29, 4  ;;  %s190_s30 = int_to_ptr.vmem [resolvable:$true] %s189_s30 }
  0x1d   :  { %218 = vmatprep.subr.mxu0 %v330_v0  ;;  %v58_v9 = vld [vmem:[#allocation6 + $0x38] sm:$0xff]  ;;  %v57_v10 = vld [vmem:[#allocation6 + $0x30] sm:$0xff]  ;;  %v56_v11 = vld [vmem:[#allocation6 + $0x28] sm:$0xff]  ;;  %s300_s5 = scalar_lea.vmem %s190_s30, 128  ;;  %p305_p11 = scmp.lt.s32.totalorder %s190_s30, %s190_s30 }
  0x1e   :  { %219 = vmatpush3.msra.mxu0 %v65_v2  ;;  %v55_v12 = vld [vmem:[#allocation6 + $0x20] sm:$0xff]  ;;  %v54_v13 = vld [vmem:[#allocation6 + $0x18] sm:$0xff]  ;;  %v53_v14 = vld [vmem:[#allocation6 + $0x10] sm:$0xff]  ;;  %v170_v41 = vsub.s32 0, %v169_v39  ;;  %p301_p10 = scmp.ne.s32.totalorder %s190_s30, %s300_s5  ;;  %p306_p12 = scmp.lt.s32.totalorder %s300_s5, %s300_s5 }
  0x1f   :  { %220 = vmatprep.subr.mxu0 %v330_v0  ;;  %v52_v15 = vld [vmem:[#allocation6 + $0x8] sm:$0xff]  ;;  %v51_v16 = vld [vmem:[#allocation6] sm:$0xff]  ;;  %v50_v17 = vld [vmem:[#allocation3] sm:$0xff] }
  0x20   :  { %221 = vmatpush3.msra.mxu0 %v64_v3  ;;  %v160_v40 = vld [vmem:[%s375_s2] sm:$0x1]  ;;  %p307_p13 = por %p306_p12, %p305_p11 }
  0x21   :  { %222 = vmatprep.subr.mxu0 %v330_v0  ;;  %v164_v44 = vld [vmem:[%s376_s3] sm:$0x1] }
  0x22   :  { %223 = vmatpush3.msra.mxu0 %v63_v4  ;;  %p308_p0 = pnand %p307_p13, %p301_p10 }
  0x23   :  { %224 = vmatprep.subr.mxu0 %v330_v0 }
  0x24   :  { %225 = vmatpush3.msra.mxu0 %v62_v5 }
  0x25   :  { %226 = vmatprep.subr.mxu0 %v330_v0 }
  0x26   :  { %227 = vmatpush3.msra.mxu0 %v61_v6 }
  0x27   :  { %228 = vmatprep.subr.mxu0 %v330_v0 }
  0x28   :  { %229 = vmatpush3.msra.mxu0 %v60_v7 }
  0x29   :  { %230 = vmatprep.subr.mxu0 %v330_v0 }
  0x2a   :  { %231 = vmatpush3.msra.mxu0 %v59_v8 }
  0x2b   :  { %232 = vmatprep.subr.mxu0 %v330_v0 }
  0x2c   :  { %233 = vmatpush3.msra.mxu0 %v58_v9 }
  0x2d   :  { %234 = vmatprep.subr.mxu0 %v330_v0 }
  0x2e   :  { %235 = vmatpush3.msra.mxu0 %v57_v10 }
  0x2f   :  { %236 = vmatprep.subr.mxu0 %v330_v0 }
  0x30   :  { %237 = vmatpush3.msra.mxu0 %v56_v11 }
  0x31   :  { %238 = vmatprep.subr.mxu0 %v330_v0 }
  0x32   :  { %239 = vmatpush3.msra.mxu0 %v55_v12 }
  0x33   :  { %240 = vmatprep.subr.mxu0 %v330_v0 }
  0x34   :  { %241 = vmatpush3.msra.mxu0 %v54_v13 }
  0x35   :  { %242 = vmatprep.subr.mxu0 %v330_v0 }
  0x36   :  { %243 = vmatpush3.msra.mxu0 %v53_v14 }
  0x37   :  { %244 = vmatprep.subr.mxu0 %v330_v0 }
  0x38   :  { %245 = vmatpush3.msra.mxu0 %v52_v15 }
  0x39   :  { %246 = vmatprep.subr.mxu0 %v330_v0 }
  0x3a   :  { %247 = vmatpush3.msra.mxu0 %v51_v16 }
  0x3b   :  { %249 = vmatmul.mubr.f32.vlgmr.msra.gmra.mxu0 %v50_v17 }
  0xfb   :  { %v133_v18 = vpop.f32.mrf.mxu0 }
  0xfc   :  { %v143_v19 = vrot.slane %v133_v18, 4  ;;  %v150_v20 = vmul.f32 %v133_v18, %v133_v18 }
  0xfd   :  { %v250_v21 = vpop.f32.mrf.mxu0 }
  0xfe   :  { %v144_v22 = vadd.f32 %v143_v19, %v133_v18  ;;  %v151_v23 = vrot.slane %v150_v20, 4 }
 0x100   :  { %v145_v24 = vrot.slane %v144_v22, 2  ;;  %v152_v25 = vadd.f32 %v151_v23, %v150_v20 }
 0x102   :  { %v146_v26 = vadd.f32 %v145_v24, %v144_v22  ;;  %v153_v27 = vrot.slane %v152_v25, 2 }
 0x104   :  { %v147_v28 = vrot.slane %v146_v26, 1  ;;  %v154_v29 = vadd.f32 %v153_v27, %v152_v25 }
 0x106   :  { %v148_v30 = vadd.f32 %v147_v28, %v146_v26  ;;  %v155_v31 = vrot.slane %v154_v29, 1 }
 0x108   :  { %v149_v32 = vmul.f32 0.125, %v148_v30  ;;  %v156_v33 = vadd.f32 %v155_v31, %v154_v29 }
 0x10a   :  { %v157_v34 = vmul.f32 0.125, %v156_v33  ;;  %v158_v35 = vmul.f32 %v149_v32, %v149_v32 }
 0x10c   :  { %v159_v36 = vsub.f32 %v157_v34, %v158_v35 }
 0x10e   :  { %v161_v37 = vadd.f32 1e-05, %v159_v36 }
 0x110   :  { %258 = vrsqrt.f32 %v161_v37 }
 0x11d   :  { %v259_v42 = vpop.eup %258 }
 0x11e   :  { %v163_v43 = vmul.f32 %v259_v42, %v160_v40 }
 0x120   :  { %v171_v45 = vrot.slane %v163_v43, %v170_v41  ;;  %v165_v46 = vmul.f32 %v163_v43, %v149_v32 }
 0x122   :  { %v166_v47 = vsub.f32 %v164_v44, %v165_v46  ;;  %v173_v48 = vmul.f32 %v171_v45, %v133_v18 }
 0x124   :  { %v178_v49 = vrot.slane %v166_v47, %v170_v41 }
 0x126   :  { %v180_v50 = vadd.f32 %v178_v49, %v173_v48 }
 0x128   :  { %v181_v51 = vmax.f32 %v180_v50, 0.0 }
 0x12a   :  { %182 = vst [vmem:[#allocation8] sm:$0xff] %v181_v51 }
 0x12b   :  { %311 = shalt.err (!%p308_p0)
}
 0x12c   :  { %192 = dma.vmem_to_hbm [thread:$0]  %s190_s30, 128, %s377_s4, [#allocation5]  }
 0x12d   :  { %324 = dma.done.wait [#allocation5], 128  }
 0x12e   :  { %325 = vsyncadd [#allocation5], 4294967168 }
 0x12f   :  { %196 = vsyncpa [#allocation4], 1 }
 0x130   :  { %197 = vsyncpa [#allocation7], 1 }
 0x131   :  { %198 = vsyncpa [#allocation5], 1 }

</bundles_post_ra>
